<compile_context>
chip_gen: v5e
topology: v5e:2x2
jax: 0.10.0
libtpu: 0.0.40
codegen_flags: <defaults>
</compile_context>

<pallas_src>
import functools

import jax
import jax.numpy as jnp
from jax.experimental import pallas as pl
from jax.experimental.pallas import tpu as pltpu

BN_EPS = 1e-5
_LANE = 128
_SUBLANE = 8


def _round_up(x, m):
    return (x + m - 1) // m * m


def _pad_axis(a, axis, mult):
    pad = _round_up(a.shape[axis], mult) - a.shape[axis]
    if pad == 0:
        return a
    widths = [(0, 0)] * a.ndim
    widths[axis] = (0, pad)
    return jnp.pad(a, widths)


def _tpu_vmem_capacity_bytes():
    """Physical per-core VMEM (generation aware) with a conservative fallback."""
    try:
        cap = int(pltpu.get_tpu_info().vmem_capacity_bytes)
        if cap > 0:
            return cap
    except Exception:
        pass
    return 64 * 1024 * 1024  # v7x per-TensorCore VMEM; safe lower bound


_VMEM_PHYS = _tpu_vmem_capacity_bytes()
_VMEM_LIMIT = int(_VMEM_PHYS * 0.90)   # scoped-vmem limit handed to Mosaic
_TILE_BUDGET = int(_VMEM_PHYS * 0.70)  # target for blocks + resident operands


def _choose_tile_n(n, min_tile, row_bytes, resident_bytes, budget):
    """Largest batch tile whose double-buffered blocks + resident operands fit."""
    n_r = _round_up(max(n, 1), min_tile)
    # Prefer >= 4 grid steps when the batch allows it so both v7x TensorCores
    # get pipelined work (harmless on single-TC v5e/v6e).
    cap = max(min_tile, _round_up(-(-n_r // 4), min_tile))
    for cand in (1024, 512, 384, 256, 192, 128, 96, 64, 48, 32, 16, 8):
        if cand % min_tile or cand > n_r or cand > cap:
            continue
        if 2 * cand * row_bytes + resident_bytes <= budget:
            return cand
    return min_tile


# ---------------------------------------------------------------------------
# Stage A: adaptive avg-pool + fc0, per-tile BN0 partial statistics.
# ---------------------------------------------------------------------------
def _pool_fc0_kernel(x_ref, w0_ref, h_ref, hsum_ref, hsq_ref):
    # x_ref : (TN, C, HW)   input tile, native layout & dtype (no relayout)
    # w0_ref: (C, HIDp)     fc0 weight, pre-scaled by 1/HW, resident in VMEM
    # h_ref : (TN, HIDp)    fc0 output tile (matmul dtype)
    # hsum_ref / hsq_ref : (1, 1, HIDp) f32 per-tile sum(h) / sum(h*h)
    pooled = jnp.sum(x_ref[...], axis=2, dtype=jnp.float32)          # (TN, C)
    h = jnp.dot(pooled.astype(w0_ref.dtype), w0_ref[...],
                preferred_element_type=jnp.float32)                  # (TN, HIDp)
    h_ref[...] = h.astype(h_ref.dtype)
    # Zero batch-padding rows give exactly h == 0, so the partial sums need no
    # masking; the denominator downstream is the real batch size N.
    hsum_ref[...] = jnp.sum(h, axis=0, keepdims=True)[None]
    hsq_ref[...] = jnp.sum(h * h, axis=0, keepdims=True)[None]


# ---------------------------------------------------------------------------
# Stage B: fused BN0 affine -> ReLU -> fc1, per-tile BN1 partial statistics.
# ---------------------------------------------------------------------------
def _bn0_relu_fc1_kernel(h_ref, sc0_ref, sh0_ref, w1_ref,
                         y_ref, ysum_ref, ysq_ref,
                         *, tile_n, n_valid, need_mask):
    h = h_ref[...].astype(jnp.float32)
    hr = jnp.maximum(h * sc0_ref[...] + sh0_ref[...], 0.0)
    if need_mask:
        # Zero padded batch rows so they contribute nothing to y or its stats.
        row0 = pl.program_id(0) * tile_n
        rows = jax.lax.broadcasted_iota(jnp.int32, hr.shape, 0)
        hr = jnp.where(rows + row0 < n_valid, hr, 0.0)
    y = jnp.dot(hr.astype(w1_ref.dtype), w1_ref[...],
                preferred_element_type=jnp.float32)                  # (TN, OUTp)
    y_ref[...] = y.astype(y_ref.dtype)
    ysum_ref[...] = jnp.sum(y, axis=0, keepdims=True)[None]
    ysq_ref[...] = jnp.sum(y * y, axis=0, keepdims=True)[None]


# ---------------------------------------------------------------------------
# Stage C: final BatchNorm1d(affine=False) normalization.
# ---------------------------------------------------------------------------
def _bn1_kernel(y_ref, sc1_ref, sh1_ref, o_ref):
    o_ref[...] = y_ref[...].astype(jnp.float32) * sc1_ref[...] + sh1_ref[...]


@functools.partial(jax.jit, static_argnames=("matmul_dtype",))
def nonlinear_neck_v3(x_nchw, w0, b0, g0, beta0, w1, b1,
                      matmul_dtype=jnp.bfloat16):
    """NonLinearNeckV3 forward (training-mode BatchNorm).

    Linear weights are stored as (in_features, out_features). b0/b1 are
    accepted for API parity but intentionally unused in-kernel: a constant
    bias immediately before a training-mode BatchNorm cancels exactly in the
    mean subtraction (verified against the reference in __main__).
    """
    del b0, b1
    N, C, H, W = x_nchw.shape
    hid = w0.shape[1]
    out_c = w1.shape[1]
    HW = H * W

    HIDp = _round_up(hid, _LANE)
    OUTp = _round_up(out_c, _LANE)
    mm_size = jnp.dtype(matmul_dtype).itemsize
    x_size = jnp.dtype(x_nchw.dtype).itemsize

    # ---- batch tile selection (VMEM-budget & generation aware) -------------
    # Per-row VMEM bytes (lane/sublane padded) of each stage's pipelined blocks
    # plus the resident (single-copy) operand footprint.
    row_a = _round_up(C, _SUBLANE) * _round_up(HW, _LANE) * x_size + HIDp * mm_size
    row_b = HIDp * mm_size + OUTp * mm_size
    resident = max(C * HIDp, HIDp * OUTp) * mm_size + 8 * max(HIDp, OUTp) * 4
    min_tile = 16 if mm_size < 4 else _SUBLANE   # packed-dtype sublane granularity
    tile_n = _choose_tile_n(N, min_tile, max(row_a, row_b), resident, _TILE_BUDGET)
    Np = _round_up(N, tile_n)
    n_tiles = Np // tile_n
    grid = (n_tiles,)

    # ---- wrapper-side prep: ONLY small weight/param tensors are touched ----
    # The big activation stays in its native layout/dtype (reshape of
    # contiguous minor dims is a free bitcast; batch pad is a no-op whenever
    # tile_n divides N, e.g. for power-of-two production batches).
    x = x_nchw.reshape(N, C, HW)
    x = _pad_axis(x, 0, tile_n)
    inv_hw = 1.0 / float(HW)
    # Zero padding of feature dims is exact: padded weight rows/cols are zero,
    # so padded lanes stay zero end-to-end and are sliced off at the end.
    w0p = _pad_axis(w0.astype(jnp.float32) * inv_hw, 1, _LANE).astype(matmul_dtype)
    w1p = _pad_axis(_pad_axis(w1, 0, _LANE), 1, _LANE).astype(matmul_dtype)
    g0p = _pad_axis(g0.reshape(1, -1), 1, _LANE).astype(jnp.float32)
    beta0p = _pad_axis(beta0.reshape(1, -1), 1, _LANE).astype(jnp.float32)

    # Grid-invariant operands: whole-array VMEM residents (single copy, no
    # per-step double-buffered DMA).
    resident_vmem = pl.BlockSpec(memory_space=pltpu.MemorySpace.VMEM)

    # ---- stage A: avg-pool + fc0 + BN0 partial stats ------------------------
    h_pre, hsum, hsq = pl.pallas_call(
        _pool_fc0_kernel,
        grid=grid,
        in_specs=[
            pl.BlockSpec((tile_n, C, HW), lambda i: (i, 0, 0)),
            resident_vmem,                    # w0 (pool scale folded in)
        ],
        out_specs=(
            pl.BlockSpec((tile_n, HIDp), lambda i: (i, 0)),
            pl.BlockSpec((1, 1, HIDp), lambda i: (i, 0, 0)),
            pl.BlockSpec((1, 1, HIDp), lambda i: (i, 0, 0)),
        ),
        out_shape=(
            jax.ShapeDtypeStruct((Np, HIDp), matmul_dtype),
            jax.ShapeDtypeStruct((n_tiles, 1, HIDp), jnp.float32),
            jax.ShapeDtypeStruct((n_tiles, 1, HIDp), jnp.float32),
        ),
        compiler_params=pltpu.CompilerParams(
            dimension_semantics=("parallel",),
            vmem_limit_bytes=_VMEM_LIMIT),
        cost_estimate=pl.CostEstimate(
            flops=int(2 * Np * C * HIDp + Np * C * HW),
            transcendentals=0,
            bytes_accessed=int(Np * C * HW * x_size + C * HIDp * mm_size
                               + Np * HIDp * mm_size)),
    )(x, w0p)

    # ---- tiny cross-tile reductions + BN0 affine fold (XLA) ----------------
    mean0 = jnp.sum(hsum, axis=0) / N                                 # (1, HIDp)
    var0 = jnp.maximum(jnp.sum(hsq, axis=0) / N - mean0 * mean0, 0.0)
    scale0 = g0p * jax.lax.rsqrt(var0 + BN_EPS)
    shift0 = beta0p - mean0 * scale0

    # ---- stage B: BN0 -> ReLU -> fc1 + BN1 partial stats --------------------
    kernel_b = functools.partial(_bn0_relu_fc1_kernel, tile_n=tile_n,
                                 n_valid=N, need_mask=(Np != N))
    y_pre, ysum, ysq = pl.pallas_call(
        kernel_b,
        grid=grid,
        in_specs=[
            pl.BlockSpec((tile_n, HIDp), lambda i: (i, 0)),
            resident_vmem,                    # scale0
            resident_vmem,                    # shift0
            resident_vmem,                    # w1
        ],
        out_specs=(
            pl.BlockSpec((tile_n, OUTp), lambda i: (i, 0)),
            pl.BlockSpec((1, 1, OUTp), lambda i: (i, 0, 0)),
            pl.BlockSpec((1, 1, OUTp), lambda i: (i, 0, 0)),
        ),
        out_shape=(
            jax.ShapeDtypeStruct((Np, OUTp), matmul_dtype),
            jax.ShapeDtypeStruct((n_tiles, 1, OUTp), jnp.float32),
            jax.ShapeDtypeStruct((n_tiles, 1, OUTp), jnp.float32),
        ),
        compiler_params=pltpu.CompilerParams(
            dimension_semantics=("parallel",),
            vmem_limit_bytes=_VMEM_LIMIT),
        cost_estimate=pl.CostEstimate(
            flops=int(2 * Np * HIDp * OUTp + 6 * Np * HIDp),
            transcendentals=0,
            bytes_accessed=int(Np * HIDp * mm_size + HIDp * OUTp * mm_size
                               + Np * OUTp * mm_size)),
    )(h_pre, scale0, shift0, w1p)

    # ---- BN1 statistics (affine=False) --------------------------------------
    mean1 = jnp.sum(ysum, axis=0) / N                                 # (1, OUTp)
    var1 = jnp.maximum(jnp.sum(ysq, axis=0) / N - mean1 * mean1, 0.0)
    scale1 = jax.lax.rsqrt(var1 + BN_EPS)
    shift1 = -mean1 * scale1

    # ---- stage C: final normalize -------------------------------------------
    out = pl.pallas_call(
        _bn1_kernel,
        grid=grid,
        in_specs=[
            pl.BlockSpec((tile_n, OUTp), lambda i: (i, 0)),
            resident_vmem,                    # scale1
            resident_vmem,                    # shift1
        ],
        out_specs=pl.BlockSpec((tile_n, OUTp), lambda i: (i, 0)),
        out_shape=jax.ShapeDtypeStruct((Np, OUTp), jnp.float32),
        compiler_params=pltpu.CompilerParams(
            dimension_semantics=("parallel",),
            vmem_limit_bytes=_VMEM_LIMIT),
    )(y_pre, scale1, shift1)

    # Strip batch / feature padding (tiny output tensor; all in-kernel stores
    # stayed lane-dense).
    return out[:N, :out_c]


def _reference(x_nchw, w0, b0, g0, beta0, w1, b1):
    pooled = jnp.mean(x_nchw, axis=(2, 3))
    h = pooled @ w0 + b0
    m0 = jnp.mean(h, axis=0)
    v0 = jnp.mean((h - m0) ** 2, axis=0)
    h = (h - m0) * jax.lax.rsqrt(v0 + BN_EPS) * g0 + beta0
    h = jnp.maximum(h, 0.0)
    y = h @ w1 + b1
    m1 = jnp.mean(y, axis=0)
    v1 = jnp.mean((y - m1) ** 2, axis=0)
    return (y - m1) * jax.lax.rsqrt(v1 + BN_EPS)


if __name__ == "__main__":
    # Small shapes consistent with the module; batch chosen > one tile so the
    # multi-tile stats reduction and the padded-row masking paths both run.
    N, C, H, W = 24, 4, 16, 16
    hid_channels, out_channels = 32, 16

    key = jax.random.PRNGKey(0)
    kx, kw0, kw1, kg0, kbt, kb0, kb1 = jax.random.split(key, 7)

    x = jax.random.normal(kx, (N, C, H, W), dtype=jnp.float32)
    # Linear weights ~ N(0, 0.01^2) as in _init_weights(init_linear='normal').
    w0 = 0.01 * jax.random.normal(kw0, (C, hid_channels), dtype=jnp.float32)
    w1 = 0.01 * jax.random.normal(kw1, (hid_channels, out_channels),
                                  dtype=jnp.float32)
    # Non-zero Linear biases: training-mode BN must cancel them exactly, so the
    # kernel (which drops them) has to match the reference (which keeps them).
    b0 = 0.05 * jax.random.normal(kb0, (hid_channels,), dtype=jnp.float32)
    b1 = 0.05 * jax.random.normal(kb1, (out_channels,), dtype=jnp.float32)
    # BN0 affine params (init is weight=1 / bias=0; perturbed to exercise them).
    g0 = 1.0 + 0.1 * jax.random.normal(kg0, (hid_channels,), dtype=jnp.float32)
    beta0 = 0.1 * jax.random.normal(kbt, (hid_channels,), dtype=jnp.float32)

    ref = _reference(x, w0, b0, g0, beta0, w1, b1)

    # Exact-math path: f32 matmuls / f32 intermediates vs the f32 reference.
    out_f32 = jax.block_until_ready(
        nonlinear_neck_v3(x, w0, b0, g0, beta0, w1, b1,
                          matmul_dtype=jnp.float32))
    assert out_f32.shape == (N, out_channels)
    assert jnp.allclose(out_f32, ref, atol=2e-3, rtol=2e-3), \
        "f32 kernel mismatch vs reference"

    # Performance path: bf16 matmuls + bf16 intermediates, f32 statistics.
    out_bf16 = jax.block_until_ready(
        nonlinear_neck_v3(x, w0, b0, g0, beta0, w1, b1))
    assert out_bf16.shape == (N, out_channels)
    assert jnp.allclose(out_bf16, ref, atol=1e-1, rtol=1e-1), \
        "bf16 kernel drifted too far from the f32 reference"

    print("KERNEL_OK")
</pallas_src>

<mosaic_0001>
module attributes {stable_mosaic.version = 11 : i64} {
  func.func @_pool_fc0_kernel(%arg0: i32, %arg1: memref<8x4x256xf32, #tpu.memory_space<vmem>>, %arg2: memref<4x128xf32, #tpu.memory_space<vmem>>, %arg3: memref<8x128xf32, #tpu.memory_space<vmem>>, %arg4: memref<1x1x128xf32, #tpu.memory_space<vmem>>, %arg5: memref<1x1x128xf32, #tpu.memory_space<vmem>>) attributes {dimension_semantics = [#tpu.dimension_semantics<parallel>], iteration_bounds = array<i64: 3>, scalar_prefetch = 0 : i64, scratch_operands = 0 : i64, tpu.core_type = #tpu.core_type<tc>, window_params = [{transform_indices = @transform_0, window_bounds = array<i64: 8, 4, 256>}, {pipeline_mode = #tpu.pipeline_mode<synchronous>, transform_indices = @transform_1, window_bounds = array<i64: 4, 128>}, {transform_indices = @transform_2, window_bounds = array<i64: 8, 128>}, {transform_indices = @transform_3, window_bounds = array<i64: 1, 1, 128>}, {transform_indices = @transform_4, window_bounds = array<i64: 1, 1, 128>}]} {
    %c0 = arith.constant 0 : index
    %c0_0 = arith.constant 0 : index
    %c0_1 = arith.constant 0 : index
    %0 = vector.load %arg1[%c0, %c0_0, %c0_1] : memref<8x4x256xf32, #tpu.memory_space<vmem>>, vector<8x4x256xf32>
    %cst = arith.constant dense<0.000000e+00> : vector<8x4xf32>
    %1 = vector.multi_reduction <add>, %0, %cst [2] : vector<8x4x256xf32> to vector<8x4xf32>
    %c0_2 = arith.constant 0 : index
    %c0_3 = arith.constant 0 : index
    %2 = vector.load %arg2[%c0_2, %c0_3] : memref<4x128xf32, #tpu.memory_space<vmem>>, vector<4x128xf32>
    %cst_4 = arith.constant dense<0.000000e+00> : vector<8x128xf32>
    %3 = tpu.matmul %1, %2, %cst_4 {dimension_numbers = #tpu.dot_dimension_numbers<[1], [0], [0], [1], [0, 0, 1, 1], [], []>} : vector<8x4xf32>, vector<4x128xf32>, vector<8x128xf32> -> vector<8x128xf32>
    %c0_5 = arith.constant 0 : index
    %c0_6 = arith.constant 0 : index
    %4 = vector.load %arg3[%c0_5, %c0_6] : memref<8x128xf32, #tpu.memory_space<vmem>>, vector<8x128xf32>
    tpu.vector_store %arg3[%c0_5, %c0_6], %3 {strides = array<i32>} : memref<8x128xf32, #tpu.memory_space<vmem>>, vector<8x128xf32>,
    %cst_7 = arith.constant dense<0.000000e+00> : vector<128xf32>
    %5 = vector.multi_reduction <add>, %3, %cst_7 [0] : vector<8x128xf32> to vector<128xf32>
    %6 = vector.shape_cast %5 : vector<128xf32> to vector<1x128xf32>
    %7 = vector.shape_cast %6 : vector<1x128xf32> to vector<1x1x128xf32>
    %c0_8 = arith.constant 0 : index
    %c0_9 = arith.constant 0 : index
    %c0_10 = arith.constant 0 : index
    %8 = vector.load %arg4[%c0_8, %c0_9, %c0_10] : memref<1x1x128xf32, #tpu.memory_space<vmem>>, vector<1x1x128xf32>
    tpu.vector_store %arg4[%c0_8, %c0_9, %c0_10], %7 {strides = array<i32>} : memref<1x1x128xf32, #tpu.memory_space<vmem>>, vector<1x1x128xf32>,
    %9 = arith.mulf %3, %3 : vector<8x128xf32>
    %cst_11 = arith.constant dense<0.000000e+00> : vector<128xf32>
    %10 = vector.multi_reduction <add>, %9, %cst_11 [0] : vector<8x128xf32> to vector<128xf32>
    %11 = vector.shape_cast %10 : vector<128xf32> to vector<1x128xf32>
    %12 = vector.shape_cast %11 : vector<1x128xf32> to vector<1x1x128xf32>
    %c0_12 = arith.constant 0 : index
    %c0_13 = arith.constant 0 : index
    %c0_14 = arith.constant 0 : index
    %13 = vector.load %arg5[%c0_12, %c0_13, %c0_14] : memref<1x1x128xf32, #tpu.memory_space<vmem>>, vector<1x1x128xf32>
    tpu.vector_store %arg5[%c0_12, %c0_13, %c0_14], %12 {strides = array<i32>} : memref<1x1x128xf32, #tpu.memory_space<vmem>>, vector<1x1x128xf32>,
    return
  }
  func.func @transform_0(%arg0: i32) -> (i32, i32, i32) {
    %c0_i32 = arith.constant 0 : i32
    %c0_i32_0 = arith.constant 0 : i32
    %c0_i32_1 = arith.constant 0 : i32
    return %arg0, %c0_i32, %c0_i32_0 : i32, i32, i32
  }
  func.func @transform_1(%arg0: i32) -> (i32, i32) {
    %c0_i32 = arith.constant 0 : i32
    %c0_i32_0 = arith.constant 0 : i32
    %c0_i32_1 = arith.constant 0 : i32
    return %c0_i32, %c0_i32_0 : i32, i32
  }
  func.func @transform_2(%arg0: i32) -> (i32, i32) {
    %c0_i32 = arith.constant 0 : i32
    %c0_i32_0 = arith.constant 0 : i32
    return %arg0, %c0_i32 : i32, i32
  }
  func.func @transform_3(%arg0: i32) -> (i32, i32, i32) {
    %c0_i32 = arith.constant 0 : i32
    %c0_i32_0 = arith.constant 0 : i32
    %c0_i32_1 = arith.constant 0 : i32
    return %arg0, %c0_i32, %c0_i32_0 : i32, i32, i32
  }
  func.func @transform_4(%arg0: i32) -> (i32, i32, i32) {
    %c0_i32 = arith.constant 0 : i32
    %c0_i32_0 = arith.constant 0 : i32
    %c0_i32_1 = arith.constant 0 : i32
    return %arg0, %c0_i32, %c0_i32_0 : i32, i32, i32
  }
}

module attributes {stable_mosaic.version = 11 : i64} {
  func.func @_bn0_relu_fc1_kernel(%arg0: i32, %arg1: memref<8x128xf32, #tpu.memory_space<vmem>>, %arg2: memref<1x128xf32, #tpu.memory_space<vmem>>, %arg3: memref<1x128xf32, #tpu.memory_space<vmem>>, %arg4: memref<128x128xf32, #tpu.memory_space<vmem>>, %arg5: memref<8x128xf32, #tpu.memory_space<vmem>>, %arg6: memref<1x1x128xf32, #tpu.memory_space<vmem>>, %arg7: memref<1x1x128xf32, #tpu.memory_space<vmem>>) attributes {dimension_semantics = [#tpu.dimension_semantics<parallel>], iteration_bounds = array<i64: 3>, scalar_prefetch = 0 : i64, scratch_operands = 0 : i64, tpu.core_type = #tpu.core_type<tc>, window_params = [{transform_indices = @transform_0, window_bounds = array<i64: 8, 128>}, {pipeline_mode = #tpu.pipeline_mode<synchronous>, transform_indices = @transform_1, window_bounds = array<i64: 1, 128>}, {pipeline_mode = #tpu.pipeline_mode<synchronous>, transform_indices = @transform_2, window_bounds = array<i64: 1, 128>}, {pipeline_mode = #tpu.pipeline_mode<synchronous>, transform_indices = @transform_3, window_bounds = array<i64: 128, 128>}, {transform_indices = @transform_4, window_bounds = array<i64: 8, 128>}, {transform_indices = @transform_5, window_bounds = array<i64: 1, 1, 128>}, {transform_indices = @transform_6, window_bounds = array<i64: 1, 1, 128>}]} {
    %c0 = arith.constant 0 : index
    %c0_0 = arith.constant 0 : index
    %0 = vector.load %arg1[%c0, %c0_0] : memref<8x128xf32, #tpu.memory_space<vmem>>, vector<8x128xf32>
    %c0_1 = arith.constant 0 : index
    %c0_2 = arith.constant 0 : index
    %1 = vector.load %arg2[%c0_1, %c0_2] : memref<1x128xf32, #tpu.memory_space<vmem>>, vector<1x128xf32>
    %2 = vector.broadcast %1 : vector<1x128xf32> to vector<8x128xf32>
    %3 = arith.mulf %0, %2 : vector<8x128xf32>
    %c0_3 = arith.constant 0 : index
    %c0_4 = arith.constant 0 : index
    %4 = vector.load %arg3[%c0_3, %c0_4] : memref<1x128xf32, #tpu.memory_space<vmem>>, vector<1x128xf32>
    %5 = vector.broadcast %4 : vector<1x128xf32> to vector<8x128xf32>
    %6 = arith.addf %3, %5 : vector<8x128xf32>
    %cst = arith.constant 0.000000e+00 : f32
    %7 = vector.broadcast %cst : f32 to vector<8x128xf32>
    %8 = arith.maximumf %6, %7 : vector<8x128xf32>
    %c0_5 = arith.constant 0 : index
    %c0_6 = arith.constant 0 : index
    %9 = vector.load %arg4[%c0_5, %c0_6] : memref<128x128xf32, #tpu.memory_space<vmem>>, vector<128x128xf32>
    %cst_7 = arith.constant dense<0.000000e+00> : vector<8x128xf32>
    %10 = tpu.matmul %8, %9, %cst_7 {dimension_numbers = #tpu.dot_dimension_numbers<[1], [0], [0], [1], [0, 0, 1, 1], [], []>} : vector<8x128xf32>, vector<128x128xf32>, vector<8x128xf32> -> vector<8x128xf32>
    %c0_8 = arith.constant 0 : index
    %c0_9 = arith.constant 0 : index
    %11 = vector.load %arg5[%c0_8, %c0_9] : memref<8x128xf32, #tpu.memory_space<vmem>>, vector<8x128xf32>
    tpu.vector_store %arg5[%c0_8, %c0_9], %10 {strides = array<i32>} : memref<8x128xf32, #tpu.memory_space<vmem>>, vector<8x128xf32>,
    %cst_10 = arith.constant dense<0.000000e+00> : vector<128xf32>
    %12 = vector.multi_reduction <add>, %10, %cst_10 [0] : vector<8x128xf32> to vector<128xf32>
    %13 = vector.shape_cast %12 : vector<128xf32> to vector<1x128xf32>
    %14 = vector.shape_cast %13 : vector<1x128xf32> to vector<1x1x128xf32>
    %c0_11 = arith.constant 0 : index
    %c0_12 = arith.constant 0 : index
    %c0_13 = arith.constant 0 : index
    %15 = vector.load %arg6[%c0_11, %c0_12, %c0_13] : memref<1x1x128xf32, #tpu.memory_space<vmem>>, vector<1x1x128xf32>
    tpu.vector_store %arg6[%c0_11, %c0_12, %c0_13], %14 {strides = array<i32>} : memref<1x1x128xf32, #tpu.memory_space<vmem>>, vector<1x1x128xf32>,
    %16 = arith.mulf %10, %10 : vector<8x128xf32>
    %cst_14 = arith.constant dense<0.000000e+00> : vector<128xf32>
    %17 = vector.multi_reduction <add>, %16, %cst_14 [0] : vector<8x128xf32> to vector<128xf32>
    %18 = vector.shape_cast %17 : vector<128xf32> to vector<1x128xf32>
    %19 = vector.shape_cast %18 : vector<1x128xf32> to vector<1x1x128xf32>
    %c0_15 = arith.constant 0 : index
    %c0_16 = arith.constant 0 : index
    %c0_17 = arith.constant 0 : index
    %20 = vector.load %arg7[%c0_15, %c0_16, %c0_17] : memref<1x1x128xf32, #tpu.memory_space<vmem>>, vector<1x1x128xf32>
    tpu.vector_store %arg7[%c0_15, %c0_16, %c0_17], %19 {strides = array<i32>} : memref<1x1x128xf32, #tpu.memory_space<vmem>>, vector<1x1x128xf32>,
    return
  }
  func.func @transform_0(%arg0: i32) -> (i32, i32) {
    %c0_i32 = arith.constant 0 : i32
    %c0_i32_0 = arith.constant 0 : i32
    return %arg0, %c0_i32 : i32, i32
  }
  func.func @transform_1(%arg0: i32) -> (i32, i32) {
    %c0_i32 = arith.constant 0 : i32
    %c0_i32_0 = arith.constant 0 : i32
    %c0_i32_1 = arith.constant 0 : i32
    return %c0_i32, %c0_i32_0 : i32, i32
  }
  func.func @transform_2(%arg0: i32) -> (i32, i32) {
    %c0_i32 = arith.constant 0 : i32
    %c0_i32_0 = arith.constant 0 : i32
    %c0_i32_1 = arith.constant 0 : i32
    return %c0_i32, %c0_i32_0 : i32, i32
  }
  func.func @transform_3(%arg0: i32) -> (i32, i32) {
    %c0_i32 = arith.constant 0 : i32
    %c0_i32_0 = arith.constant 0 : i32
    %c0_i32_1 = arith.constant 0 : i32
    return %c0_i32, %c0_i32_0 : i32, i32
  }
  func.func @transform_4(%arg0: i32) -> (i32, i32) {
    %c0_i32 = arith.constant 0 : i32
    %c0_i32_0 = arith.constant 0 : i32
    return %arg0, %c0_i32 : i32, i32
  }
  func.func @transform_5(%arg0: i32) -> (i32, i32, i32) {
    %c0_i32 = arith.constant 0 : i32
    %c0_i32_0 = arith.constant 0 : i32
    %c0_i32_1 = arith.constant 0 : i32
    return %arg0, %c0_i32, %c0_i32_0 : i32, i32, i32
  }
  func.func @transform_6(%arg0: i32) -> (i32, i32, i32) {
    %c0_i32 = arith.constant 0 : i32
    %c0_i32_0 = arith.constant 0 : i32
    %c0_i32_1 = arith.constant 0 : i32
    return %arg0, %c0_i32, %c0_i32_0 : i32, i32, i32
  }
}

module attributes {stable_mosaic.version = 11 : i64} {
  func.func @_bn1_kernel(%arg0: i32, %arg1: memref<8x128xf32, #tpu.memory_space<vmem>>, %arg2: memref<1x128xf32, #tpu.memory_space<vmem>>, %arg3: memref<1x128xf32, #tpu.memory_space<vmem>>, %arg4: memref<8x128xf32, #tpu.memory_space<vmem>>) attributes {dimension_semantics = [#tpu.dimension_semantics<parallel>], iteration_bounds = array<i64: 3>, scalar_prefetch = 0 : i64, scratch_operands = 0 : i64, tpu.core_type = #tpu.core_type<tc>, window_params = [{transform_indices = @transform_0, window_bounds = array<i64: 8, 128>}, {pipeline_mode = #tpu.pipeline_mode<synchronous>, transform_indices = @transform_1, window_bounds = array<i64: 1, 128>}, {pipeline_mode = #tpu.pipeline_mode<synchronous>, transform_indices = @transform_2, window_bounds = array<i64: 1, 128>}, {transform_indices = @transform_3, window_bounds = array<i64: 8, 128>}]} {
    %c0 = arith.constant 0 : index
    %c0_0 = arith.constant 0 : index
    %0 = vector.load %arg1[%c0, %c0_0] : memref<8x128xf32, #tpu.memory_space<vmem>>, vector<8x128xf32>
    %c0_1 = arith.constant 0 : index
    %c0_2 = arith.constant 0 : index
    %1 = vector.load %arg2[%c0_1, %c0_2] : memref<1x128xf32, #tpu.memory_space<vmem>>, vector<1x128xf32>
    %2 = vector.broadcast %1 : vector<1x128xf32> to vector<8x128xf32>
    %3 = arith.mulf %0, %2 : vector<8x128xf32>
    %c0_3 = arith.constant 0 : index
    %c0_4 = arith.constant 0 : index
    %4 = vector.load %arg3[%c0_3, %c0_4] : memref<1x128xf32, #tpu.memory_space<vmem>>, vector<1x128xf32>
    %5 = vector.broadcast %4 : vector<1x128xf32> to vector<8x128xf32>
    %6 = arith.addf %3, %5 : vector<8x128xf32>
    %c0_5 = arith.constant 0 : index
    %c0_6 = arith.constant 0 : index
    %7 = vector.load %arg4[%c0_5, %c0_6] : memref<8x128xf32, #tpu.memory_space<vmem>>, vector<8x128xf32>
    tpu.vector_store %arg4[%c0_5, %c0_6], %6 {strides = array<i32>} : memref<8x128xf32, #tpu.memory_space<vmem>>, vector<8x128xf32>,
    return
  }
  func.func @transform_0(%arg0: i32) -> (i32, i32) {
    %c0_i32 = arith.constant 0 : i32
    %c0_i32_0 = arith.constant 0 : i32
    return %arg0, %c0_i32 : i32, i32
  }
  func.func @transform_1(%arg0: i32) -> (i32, i32) {
    %c0_i32 = arith.constant 0 : i32
    %c0_i32_0 = arith.constant 0 : i32
    %c0_i32_1 = arith.constant 0 : i32
    return %c0_i32, %c0_i32_0 : i32, i32
  }
  func.func @transform_2(%arg0: i32) -> (i32, i32) {
    %c0_i32 = arith.constant 0 : i32
    %c0_i32_0 = arith.constant 0 : i32
    %c0_i32_1 = arith.constant 0 : i32
    return %c0_i32, %c0_i32_0 : i32, i32
  }
  func.func @transform_3(%arg0: i32) -> (i32, i32) {
    %c0_i32 = arith.constant 0 : i32
    %c0_i32_0 = arith.constant 0 : i32
    return %arg0, %c0_i32 : i32, i32
  }
}

</mosaic_0001>

<bundles_post_ra>
// kernel: nonlinear_neck_v3.3
= control target key start
LH: loop header
LB: loop body
LE: loop exit
PB: predicated region body
PF: predicated region fallthrough
CT: control target
= control target key end

     0   :  { %s551_s15 = smov 0   ;;  %s599_s0 = inlined_call_operand.vmem [shape: f32[24,4,256], index: 0, kind: input, shape index: {}]   ;;  %s600_s1 = inlined_call_operand.vmem [shape: f32[4,128], index: 1, kind: input, shape index: {}]   ;;  %s601_s2 = inlined_call_operand.vmem [shape: f32[24,128], index: 2, kind: output, shape index: {0}]   ;;  %s602_s3 = inlined_call_operand.vmem [shape: f32[3,1,128], index: 3, kind: output, shape index: {1}]   ;;  %s603_s4 = inlined_call_operand.vmem [shape: f32[3,1,128], index: 4, kind: output, shape index: {2}]  }
   0x1 LB: > { %s557_s16 = sadd.s32 4294967295, %s524_s15   ;;  %p500_p0 = scmp.ge.s32.totalorder %s524_s15, 1  ;;  %s524_s15 = sphi %s551_s15, %s15_s15  }
   0x2   : > { %p169_p1 = scmp.lt.s32.totalorder %s524_s15, 4 }
   0x4   : > { %p170_p2 = pnand %p500_p0, %p169_p1 }
   0x5   : > { %s501_s17 = sshll.u32 (!%p170_p2), %s557_s16, 3  ;;  %p208_p4 = scmp.lt.s32.totalorder (!%p170_p2), %s557_s16, 2 }
   0x6   : > { %173 = sbr.rel (%p170_p2) target bundleno = 304 (0x130), region = 28  ;;  %p202_p3 = scmp.lt.s32.totalorder (!%p170_p2), %s501_s17, 23 }
   0xb   : > { %s605_s17 = smov (!%p202_p3, %s501_s17), 23  ;;  %vm277_vm0 = vcmask 1043456   ;;  %v318_v48 = vld [vmem:[%s600_s1] sm:$0xf]  ;;  %v327_v50 = vlaneseq  ;;  %vm337_vm1 = vcmask 1041409   ;;  %vm339_vm2 = vcmask 1042434  }
   0xc   : > { %s509_s18 = sshll.u32 %s605_s17, 3  ;;  %505 = vmatpush.msk.msra.mxu0 %vm277_vm0, %v318_v48  ;;  %vm341_vm3 = vcmask 1043459   ;;  %vm343_vm4 = vcmask 1044484   ;;  %vm345_vm5 = vcmask 1045509   ;;  %vm347_vm6 = vcmask 1046534   ;;  %s607_s16 = smov (!%p208_p4, %s557_s16), 2 }
   0xd   : > { %s206_s21 = scalar_lea.vmem %s599_s0, %s509_s18  ;;  %v328_v52 = vand.u32 127, %v327_v50  ;;  %vm349_vm7 = vcmask 1047559   ;;  %vm351_vm8 = vcmask 31744   ;;  %s504_s24 = sshll.u32 %s607_s16, 3 }
   0xe   : > { %v218_v0 = vld [vmem:[%s206_s21] sm:$0xff]  ;;  %v220_v1 = vld [vmem:[%s206_s21 + $0x10] sm:$0xff]  ;;  %v219_v2 = vld [vmem:[%s206_s21 + $0x8] sm:$0xff]  ;;  %s211_s27 = scalar_lea.vmem %s601_s2, %s504_s24  ;;  %s214_s30 = scalar_lea.vmem %s602_s3, %s607_s16 }
   0xf   : > { %234 = vst [vmem:[#allocation1] ss:$2 sm:$0xff] %v218_v0  ;;  %v221_v3 = vld [vmem:[%s206_s21 + $0x18] sm:$0xff]  ;;  %v222_v4 = vld [vmem:[%s206_s21 + $0x20] sm:$0xff]  ;;  %v224_v5 = vld [vmem:[%s206_s21 + $0x30] sm:$0xff]  ;;  %s217_s7 = scalar_lea.vmem %s603_s4, %s607_s16 }
  0x10   : > { %242 = vst [vmem:[#allocation1 + $0x20] ss:$2 sm:$0xff] %v220_v1  ;;  %v223_v10 = vld [vmem:[%s206_s21 + $0x28] sm:$0xff]  ;;  %v225_v16 = vld [vmem:[%s206_s21 + $0x38] sm:$0xff] }
  0x11   : > { %238 = vst [vmem:[#allocation1 + $0x10] ss:$2 sm:$0xff] %v219_v2 }
  0x12   : > { %246 = vst [vmem:[#allocation1 + $0x30] ss:$2 sm:$0xff] %v221_v3 }
  0x16   : > { %v235_v6 = vld.sshfl [vmem:[#allocation1] sm:$0xff pattern:$0x75316420]  ;;  %v236_v7 = vld.sshfl [vmem:[#allocation1 + $0x8] sm:$0xff pattern:$0x75316420] }
  0x17   : > { %v278_v8 = vsel %vm277_vm0, %v235_v6, 0.0  ;;  %v279_v9 = vsel %vm277_vm0, %v236_v7, 0.0  ;;  %249 = vst [vmem:[#allocation1] ss:$2 sm:$0xff] %v222_v4 }
  0x18   : > { %v280_v11 = vadd.f32 %v279_v9, %v278_v8  ;;  %v243_v12 = vld.sshfl [vmem:[#allocation1 + $0x20] sm:$0xff pattern:$0x75316420]  ;;  %v244_v13 = vld.sshfl [vmem:[#allocation1 + $0x28] sm:$0xff pattern:$0x75316420] }
  0x19   : > { %v288_v14 = vsel %vm277_vm0, %v243_v12, 0.0  ;;  %v289_v15 = vsel %vm277_vm0, %v244_v13, 0.0  ;;  %255 = vst [vmem:[#allocation1 + $0x20] ss:$2 sm:$0xff] %v224_v5 }
  0x1a   : > { %281 = vadd.xlane.f32.xlu0 %v280_v11  ;;  %v290_v17 = vadd.f32 %v289_v15, %v288_v14  ;;  %v239_v18 = vld.sshfl [vmem:[#allocation1 + $0x10] sm:$0xff pattern:$0x75316420]  ;;  %v240_v19 = vld.sshfl [vmem:[#allocation1 + $0x18] sm:$0xff pattern:$0x75316420] }
  0x1b   : > { %252 = vst [vmem:[#allocation1 + $0x10] ss:$2 sm:$0xff] %v223_v10  ;;  %v283_v20 = vsel %vm277_vm0, %v239_v18, 0.0  ;;  %v284_v21 = vsel %vm277_vm0, %v240_v19, 0.0 }
  0x1c   : > { %291 = vadd.xlane.f32.xlu1 %v290_v17  ;;  %v247_v22 = vld.sshfl [vmem:[#allocation1 + $0x30] sm:$0xff pattern:$0x75316420]  ;;  %v248_v23 = vld.sshfl [vmem:[#allocation1 + $0x38] sm:$0xff pattern:$0x75316420]  ;;  %v285_v26 = vadd.f32 %v284_v21, %v283_v20 }
  0x1d   : > { %258 = vst [vmem:[#allocation1 + $0x30] ss:$2 sm:$0xff] %v225_v16  ;;  %v293_v24 = vsel %vm277_vm0, %v247_v22, 0.0  ;;  %v294_v25 = vsel %vm277_vm0, %v248_v23, 0.0 }
  0x1e   : > { %v250_v27 = vld.sshfl [vmem:[#allocation1] sm:$0xff pattern:$0x75316420]  ;;  %v251_v28 = vld.sshfl [vmem:[#allocation1 + $0x8] sm:$0xff pattern:$0x75316420]  ;;  %v295_v32 = vadd.f32 %v294_v25, %v293_v24 }
  0x1f   : > { %v298_v29 = vsel %vm277_vm0, %v250_v27, 0.0  ;;  %v299_v30 = vsel %vm277_vm0, %v251_v28, 0.0 }
  0x20   : > { %v300_v31 = vadd.f32 %v299_v30, %v298_v29  ;;  %v256_v33 = vld.sshfl [vmem:[#allocation1 + $0x20] sm:$0xff pattern:$0x75316420]  ;;  %v257_v34 = vld.sshfl [vmem:[#allocation1 + $0x28] sm:$0xff pattern:$0x75316420] }
  0x21   : > { %v308_v39 = vsel %vm277_vm0, %v256_v33, 0.0  ;;  %v309_v40 = vsel %vm277_vm0, %v257_v34, 0.0 }
  0x22   : > { %286 = vadd.xlane.f32.xlu0 %v285_v26  ;;  %301 = vadd.xlane.f32.xlu2 %v300_v31  ;;  %v253_v35 = vld.sshfl [vmem:[#allocation1 + $0x10] sm:$0xff pattern:$0x75316420]  ;;  %v254_v36 = vld.sshfl [vmem:[#allocation1 + $0x18] sm:$0xff pattern:$0x75316420]  ;;  %v310_v46 = vadd.f32 %v309_v40, %v308_v39 }
  0x23   : > { %v303_v37 = vsel %vm277_vm0, %v253_v35, 0.0  ;;  %v304_v38 = vsel %vm277_vm0, %v254_v36, 0.0 }
  0x24   : > { %296 = vadd.xlane.f32.xlu1 %v295_v32  ;;  %v259_v41 = vld.sshfl [vmem:[#allocation1 + $0x30] sm:$0xff pattern:$0x75316420]  ;;  %v260_v42 = vld.sshfl [vmem:[#allocation1 + $0x38] sm:$0xff pattern:$0x75316420]  ;;  %v305_v45 = vadd.f32 %v304_v38, %v303_v37 }
  0x25   : > { %v313_v43 = vsel %vm277_vm0, %v259_v41, 0.0  ;;  %v314_v44 = vsel %vm277_vm0, %v260_v42, 0.0 }
  0x26   : > { %v315_v47 = vadd.f32 %v314_v44, %v313_v43 }
  0x2a   : > { %306 = vadd.xlane.f32.xlu2 %v305_v45  ;;  %311 = vadd.xlane.f32.xlu0 %v310_v46 }
  0x2c   : > { %316 = vadd.xlane.f32.xlu1 %v315_v47 }
  0x8d   : > { %v282_v49 = vpop.xlane.xlu0 %281 }
  0x8e   : > { %v329_v55 = vperm.slane %v282_v49, %v328_v52 }
  0x8f   : > { %v292_v51 = vpop.xlane.xlu1 %291 }
  0x90   : > { %v331_v57 = vperm.slane %v292_v51, %v328_v52 }
  0x95   : > { %v287_v53 = vpop.xlane.xlu0 %286  ;;  %v302_v54 = vpop.xlane.xlu2 %301 }
  0x96   : > { %v330_v56 = vperm.slane %v287_v53, %v328_v52  ;;  %v333_v63 = vperm.slane %v302_v54, %v328_v52 }
  0x97   : > { %v297_v58 = vpop.xlane.xlu1 %296 }
  0x98   : > { %v338_v59 = vsel %vm337_vm1, %v330_v56, %v329_v55  ;;  %v332_v60 = vperm.slane %v297_v58, %v328_v52 }
  0x99   : > { %v340_v61 = vsel %vm339_vm2, %v331_v57, %v338_v59 }
  0x9a   : > { %v342_v62 = vsel %vm341_vm3, %v332_v60, %v340_v61 }
  0x9b   : > { %v344_v4 = vsel %vm343_vm4, %v333_v63, %v342_v62 }
  0x9d   : > { %v307_v0 = vpop.xlane.xlu2 %306  ;;  %v312_v1 = vpop.xlane.xlu0 %311 }
  0x9e   : > { %v334_v2 = vperm.slane %v307_v0, %v328_v52  ;;  %v335_v3 = vperm.slane %v312_v1, %v328_v52 }
  0x9f   : > { %v317_v5 = vpop.xlane.xlu1 %316 }
  0xa0   : > { %v346_v6 = vsel %vm345_vm5, %v334_v2, %v344_v4  ;;  %v336_v7 = vperm.slane %v317_v5, %v328_v52 }
  0xa1   : > { %v348_v8 = vsel %vm347_vm6, %v335_v3, %v346_v6 }
  0xa2   : > { %v350_v9 = vsel %vm349_vm7, %v336_v7, %v348_v8 }
  0xa3   : > { %506 = vmatmul.msk.f32.vlgmr.msra.gmra.mxu0 %vm351_vm8, %v350_v9 }
 0x120   : > { %v374_v10 = vpop.f32.mrf.mxu0 }
 0x121   : > { %377 = vst [vmem:[%s211_s27] sm:$0xff] %v374_v10  ;;  %v378_v11 = vrot.slane %v374_v10, 4  ;;  %v385_v12 = vmul.f32 %v374_v10, %v374_v10 }
 0x123   : > { %v379_v13 = vadd.f32 %v378_v11, %v374_v10  ;;  %v386_v14 = vrot.slane %v385_v12, 4 }
 0x125   : > { %v380_v15 = vrot.slane %v379_v13, 2  ;;  %v387_v16 = vadd.f32 %v386_v14, %v385_v12 }
 0x127   : > { %v381_v17 = vadd.f32 %v380_v15, %v379_v13  ;;  %v388_v18 = vrot.slane %v387_v16, 2 }
 0x129   : > { %v382_v19 = vrot.slane %v381_v17, 1  ;;  %v389_v20 = vadd.f32 %v388_v18, %v387_v16 }
 0x12b   : > { %v383_v21 = vadd.f32 %v382_v19, %v381_v17  ;;  %v390_v22 = vrot.slane %v389_v20, 1 }
 0x12d   : > { %384 = vst [vmem:[%s214_s30] sm:$0x1] %v383_v21  ;;  %v391_v23 = vadd.f32 %v390_v22, %v389_v20 }
 0x12f   : > { %392 = vst [vmem:[%s217_s7] sm:$0x1] %v391_v23 }
 0x130 PF: > { %s15_s15 = sadd.s32 1, %s524_s15  }
 0x131   : > { %p12_p5 = scmp.ge.s32.totalorder %s15_s15, 5  }
 0x133   :  { %14 = sbr.rel (!%p12_p5) target bundleno = 1 (0x1), region = 85 }

// kernel: nonlinear_neck_v3.5
= control target key start
LH: loop header
LB: loop body
LE: loop exit
PB: predicated region body
PF: predicated region fallthrough
CT: control target
= control target key end

     0   :  { %s254_s12 = smov 0   ;;  %s290_s0 = inlined_call_operand.vmem [shape: f32[24,128], index: 0, kind: input, shape index: {}]   ;;  %s291_s1 = inlined_call_operand.vmem [shape: f32[1,128], index: 1, kind: input, shape index: {}]   ;;  %s292_s2 = inlined_call_operand.vmem [shape: f32[1,128], index: 2, kind: input, shape index: {}]   ;;  %s293_s3 = inlined_call_operand.vmem [shape: f32[24,128], index: 3, kind: output, shape index: {}]  }
   0x1 LB: > { %s231_s13 = sadd.s32 4294967295, %s256_s12   ;;  %p235_p0 = scmp.ge.s32.totalorder %s256_s12, 1  ;;  %s256_s12 = sphi %s254_s12, %s13_s12  }
   0x2   : > { %p136_p1 = scmp.lt.s32.totalorder %s256_s12, 4 }
   0x4   : > { %p137_p2 = pnand %p235_p0, %p136_p1 }
   0x5   : > { %p158_p3 = scmp.lt.s32.totalorder (!%p137_p2), %s231_s13, 2 }
   0x6   : > { %140 = sbr.rel (%p137_p2) target bundleno = 20 (0x14), region = 32 }
   0xb   : > { %s295_s13 = smov (!%p158_p3, %s231_s13), 2  ;;  %v248_v0 = vld [vmem:[%s291_s1] ss:$0 sm:$0xff] }
   0xc   : > { %s236_s16 = sshll.u32 %s295_s13, 3  ;;  %v249_v1 = vld [vmem:[%s292_s2] ss:$0 sm:$0xff] }
   0xd   : > { %s161_s19 = scalar_lea.vmem %s290_s0, %s236_s16  ;;  %s165_s24 = scalar_lea.vmem %s293_s3, %s236_s16 }
   0xe   : > { %v166_v2 = vld [vmem:[%s161_s19] sm:$0xff] }
   0xf   : > { %v171_v3 = vmul.f32 %v248_v0, %v166_v2 }
  0x11   : > { %v176_v4 = vadd.f32 %v249_v1, %v171_v3 }
  0x13   : > { %177 = vst [vmem:[%s165_s24] sm:$0xff] %v176_v4 }
  0x14 PF: > { %s13_s12 = sadd.s32 1, %s256_s12  }
  0x15   : > { %p10_p4 = scmp.ge.s32.totalorder %s13_s12, 5  }
  0x17   :  { %12 = sbr.rel (!%p10_p4) target bundleno = 1 (0x1), region = 62 }

// kernel: nonlinear_neck_v3.4
= control target key start
LH: loop header
LB: loop body
LE: loop exit
PB: predicated region body
PF: predicated region fallthrough
CT: control target
= control target key end

     0   :  { %s493_s21 = smov 0   ;;  %s575_s0 = inlined_call_operand.vmem [shape: f32[24,128], index: 0, kind: input, shape index: {}]   ;;  %s576_s1 = inlined_call_operand.vmem [shape: f32[1,128], index: 1, kind: input, shape index: {}]   ;;  %s577_s2 = inlined_call_operand.vmem [shape: f32[1,128], index: 2, kind: input, shape index: {}]   ;;  %s578_s3 = inlined_call_operand.vmem [shape: f32[128,128], index: 3, kind: input, shape index: {}]   ;;  %s579_s4 = inlined_call_operand.vmem [shape: f32[24,128], index: 4, kind: output, shape index: {0}]   ;;  %s580_s5 = inlined_call_operand.vmem [shape: f32[3,1,128], index: 5, kind: output, shape index: {1}]   ;;  %s581_s6 = inlined_call_operand.vmem [shape: f32[3,1,128], index: 6, kind: output, shape index: {2}]  }
   0x1 LB: > { %s431_s22 = sadd.s32 4294967295, %s456_s21   ;;  %p435_p0 = scmp.ge.s32.totalorder %s456_s21, 1  ;;  %s456_s21 = sphi %s493_s21, %s17_s21  }
   0x2   : > { %p216_p1 = scmp.lt.s32.totalorder %s456_s21, 4 }
   0x4   : > { %p217_p2 = pnand %p435_p0, %p216_p1 }
   0x5   : > { %p250_p3 = scmp.lt.s32.totalorder (!%p217_p2), %s431_s22, 2 }
   0x6   : > { %220 = sbr.rel (%p217_p2) target bundleno = 184 (0xb8), region = 36 }
   0xb   : > { %v291_v0 = vld [vmem:[%s578_s3 + $0x78] sm:$0xff]  ;;  %v290_v1 = vld [vmem:[%s578_s3 + $0x70] sm:$0xff]  ;;  %v289_v2 = vld [vmem:[%s578_s3 + $0x68] sm:$0xff]  ;;  %s583_s22 = smov (!%p250_p3, %s431_s22), 2 }
   0xc   : > { %292 = vmatpush.msra.mxu0 %v291_v0  ;;  %v288_v3 = vld [vmem:[%s578_s3 + $0x60] sm:$0xff]  ;;  %v287_v4 = vld [vmem:[%s578_s3 + $0x58] sm:$0xff]  ;;  %v286_v5 = vld [vmem:[%s578_s3 + $0x50] sm:$0xff]  ;;  %s436_s13 = sshll.u32 %s583_s22, 3  ;;  %s260_s25 = scalar_lea.vmem %s580_s5, %s583_s22 }
   0xd   : > { %v285_v6 = vld [vmem:[%s578_s3 + $0x48] sm:$0xff]  ;;  %v284_v7 = vld [vmem:[%s578_s3 + $0x40] sm:$0xff]  ;;  %v283_v8 = vld [vmem:[%s578_s3 + $0x38] sm:$0xff]  ;;  %s253_s20 = scalar_lea.vmem %s575_s0, %s436_s13  ;;  %s263_s27 = scalar_lea.vmem %s581_s6, %s583_s22 }
   0xe   : > { %293 = vmatpush.msra.mxu0 %v290_v1  ;;  %v282_v9 = vld [vmem:[%s578_s3 + $0x30] sm:$0xff]  ;;  %v448_v10 = vld [vmem:[%s576_s1] ss:$0 sm:$0xff]  ;;  %v281_v12 = vld [vmem:[%s578_s3 + $0x28] sm:$0xff] }
   0xf   : > { %v264_v11 = vld [vmem:[%s253_s20] sm:$0xff]  ;;  %v279_v16 = vld [vmem:[%s578_s3 + $0x18] sm:$0xff]  ;;  %v278_v17 = vld [vmem:[%s578_s3 + $0x10] sm:$0xff]  ;;  %s257_s20 = scalar_lea.vmem %s579_s4, %s436_s13 }
  0x10   : > { %294 = vmatpush.msra.mxu0 %v289_v2  ;;  %v280_v13 = vld [vmem:[%s578_s3 + $0x20] sm:$0xff]  ;;  %v269_v14 = vmul.f32 %v448_v10, %v264_v11  ;;  %v277_v19 = vld [vmem:[%s578_s3 + $0x8] sm:$0xff] }
  0x11   : > { %v449_v15 = vld [vmem:[%s577_s2] ss:$0 sm:$0xff] }
  0x12   : > { %295 = vmatpush.msra.mxu0 %v288_v3  ;;  %v274_v18 = vadd.f32 %v449_v15, %v269_v14  ;;  %v276_v20 = vld [vmem:[%s578_s3] sm:$0xff] }
  0x14   : > { %296 = vmatpush.msra.mxu0 %v287_v4  ;;  %v275_v21 = vmax.f32 %v274_v18, 0.0 }
  0x16   : > { %297 = vmatpush.msra.mxu0 %v286_v5 }
  0x18   : > { %298 = vmatpush.msra.mxu0 %v285_v6 }
  0x1a   : > { %299 = vmatpush.msra.mxu0 %v284_v7 }
  0x1c   : > { %300 = vmatpush.msra.mxu0 %v283_v8 }
  0x1e   : > { %301 = vmatpush.msra.mxu0 %v282_v9 }
  0x20   : > { %302 = vmatpush.msra.mxu0 %v281_v12 }
  0x22   : > { %303 = vmatpush.msra.mxu0 %v280_v13 }
  0x24   : > { %304 = vmatpush.msra.mxu0 %v279_v16 }
  0x26   : > { %305 = vmatpush.msra.mxu0 %v278_v17 }
  0x28   : > { %306 = vmatpush.msra.mxu0 %v277_v19 }
  0x2a   : > { %307 = vmatpush.msra.mxu0 %v276_v20 }
  0x2b   : > { %308 = vmatmul.f32.vlgmr.msra.gmra.mxu0 %v275_v21 }
  0xa8   : > { %v309_v22 = vpop.f32.mrf.mxu0 }
  0xa9   : > { %312 = vst [vmem:[%s257_s20] sm:$0xff] %v309_v22  ;;  %v313_v23 = vrot.slane %v309_v22, 4  ;;  %v320_v24 = vmul.f32 %v309_v22, %v309_v22 }
  0xab   : > { %v314_v25 = vadd.f32 %v313_v23, %v309_v22  ;;  %v321_v26 = vrot.slane %v320_v24, 4 }
  0xad   : > { %v315_v27 = vrot.slane %v314_v25, 2  ;;  %v322_v28 = vadd.f32 %v321_v26, %v320_v24 }
  0xaf   : > { %v316_v29 = vadd.f32 %v315_v27, %v314_v25  ;;  %v323_v30 = vrot.slane %v322_v28, 2 }
  0xb1   : > { %v317_v31 = vrot.slane %v316_v29, 1  ;;  %v324_v32 = vadd.f32 %v323_v30, %v322_v28 }
  0xb3   : > { %v318_v33 = vadd.f32 %v317_v31, %v316_v29  ;;  %v325_v34 = vrot.slane %v324_v32, 1 }
  0xb5   : > { %319 = vst [vmem:[%s260_s25] sm:$0x1] %v318_v33  ;;  %v326_v35 = vadd.f32 %v325_v34, %v324_v32 }
  0xb7   : > { %327 = vst [vmem:[%s263_s27] sm:$0x1] %v326_v35 }
  0xb8 PF: > { %s17_s21 = sadd.s32 1, %s456_s21  }
  0xb9   : > { %p14_p4 = scmp.ge.s32.totalorder %s17_s21, 5  }
  0xbb   :  { %16 = sbr.rel (!%p14_p4) target bundleno = 1 (0x1), region = 90 }

</bundles_post_ra>
